<compile_context>
chip_gen: v5e
topology: v5e:2x2
jax: 0.10.0
libtpu: 0.0.40
codegen_flags: <defaults>
</compile_context>

<pallas_src>
import functools

import jax
import jax.numpy as jnp
from jax.experimental import pallas as pl
from jax.experimental.pallas import tpu as pltpu


def waterlevel_kernel(x_col_ref, conv_w_ref, conv_b_ref,
                      w_ih_ref, w_hh_ref, b_ref,
                      fc_w_ref, fc_b_ref, out_ref, *, B, Lc):
    """All refs are full-array VMEM blocks (no grid; everything fits VMEM).

    x_col_ref:  (B*Lc, 3C)   im2col slab of the input (built in the wrapper)
    conv_w_ref: (3C, H)      Conv1d weight, rows ordered (k, c)
    conv_b_ref: (1, H)       Conv1d bias
    w_ih_ref:   (H, 4H)      LSTM W_ih^T (PyTorch gate order i, f, g, o)
    w_hh_ref:   (H, 4H)      LSTM W_hh^T
    b_ref:      (1, 4H)      b_ih + b_hh
    fc_w_ref:   (H, O)       Linear weight^T
    fc_b_ref:   (1, O)       Linear bias
    out_ref:    (B, O)       output (fc applied to last timestep's hidden state)
    """
    f32 = jnp.float32
    H = conv_w_ref.shape[1]
    G = 4 * H
    Lp = Lc - 2                      # MaxPool1d(kernel_size=3, stride=1) length

    # ---- Conv1d (valid, k=3) as a single im2col matmul + bias + ReLU --------
    conv = jnp.dot(x_col_ref[...].astype(f32), conv_w_ref[...],
                   preferred_element_type=f32)                    # (B*Lc, H)
    conv = jnp.maximum(conv + conv_b_ref[...], 0.0)
    conv = conv.reshape(B, Lc, H)

    # ---- MaxPool1d(kernel=3, stride=1) along time ----------------------------
    pooled = jnp.maximum(
        jnp.maximum(conv[:, 0:Lp, :], conv[:, 1:Lp + 1, :]),
        conv[:, 2:Lp + 2, :])                                     # (B, Lp, H)

    # ---- LSTM: input path hoisted out of the recurrence (one big matmul) -----
    gates_x = jnp.dot(pooled.reshape(B * Lp, H), w_ih_ref[...],
                      preferred_element_type=f32) + b_ref[...]    # (B*Lp, 4H)
    gates_x = gates_x.reshape(B, Lp, G)

    w_hh = w_hh_ref[...]                                          # (H, 4H)

    # Lane mask selecting the tanh ("g") gate lanes; hoisted out of the loop
    # (JAX does not CSE broadcast_in_dim).
    lane = jax.lax.broadcasted_iota(jnp.int32, (B, G), 1)
    g_mask = (lane >= 2 * H) & (lane < 3 * H)

    h = jnp.zeros((B, H), f32)
    c = jnp.zeros((B, H), f32)
    # Lp is tiny (=4) and static -> unrolled Python loop is fine here; switch to
    # lax.fori_loop over a (Lp, B, 4H) scratch once Lp grows past ~16.
    for t in range(Lp):
        g = gates_x[:, t, :] + jnp.dot(h, w_hh, preferred_element_type=f32)
        # One full-width sigmoid + one full-width tanh (EUP), then mask-select.
        act = jnp.where(g_mask, jnp.tanh(g), jax.nn.sigmoid(g))   # (B, 4H)
        i_g = act[:, 0 * H:1 * H]
        f_g = act[:, 1 * H:2 * H]
        g_g = act[:, 2 * H:3 * H]
        o_g = act[:, 3 * H:4 * H]
        c = f_g * c + i_g * g_g
        h = o_g * jnp.tanh(c)

    # ---- Linear on the last timestep's hidden state --------------------------
    out = jnp.dot(h, fc_w_ref[...], preferred_element_type=f32) + fc_b_ref[...]
    out_ref[...] = out.astype(out_ref.dtype)


def waterlevel_forward(x, params):
    """Wrapper: im2col + weight relayout (pure layout plumbing), then one kernel."""
    B, S, C = x.shape
    H = params["conv_b"].shape[0]
    O = params["fc_b"].shape[0]
    K = 3
    Lc = S - (K - 1)

    # im2col slab: column index = k*C + c, value = x[b, t+k, c]
    x_col = jnp.concatenate([x[:, k:k + Lc, :] for k in range(K)], axis=-1)
    x_col = x_col.reshape(B * Lc, K * C).astype(jnp.float32)

    # Conv weight (H, C, K) -> (K*C, H) with row = k*C + c
    conv_w = jnp.transpose(params["conv_w"], (2, 1, 0)).reshape(K * C, H)
    conv_b = params["conv_b"].reshape(1, H)
    w_ih = params["w_ih"].T                                       # (H, 4H)
    w_hh = params["w_hh"].T                                       # (H, 4H)
    b = (params["b_ih"] + params["b_hh"]).reshape(1, 4 * H)
    fc_w = params["fc_w"].T                                       # (H, O)
    fc_b = params["fc_b"].reshape(1, O)

    vmem = pl.BlockSpec(memory_space=pltpu.MemorySpace.VMEM)      # full-array block
    kernel = functools.partial(waterlevel_kernel, B=B, Lc=Lc)
    # At larger batch, add grid=(cdiv(B, TB),) with dimension_semantics=("parallel",)
    # to shard independent sequences across v7x's two TensorCores.
    return pl.pallas_call(
        kernel,
        out_shape=jax.ShapeDtypeStruct((B, O), jnp.float32),
        in_specs=[vmem] * 8,
        out_specs=vmem,
    )(x_col, conv_w, conv_b, w_ih, w_hh, b, fc_w, fc_b)


def init_params(key, input_size, hidden_size, output_size):
    """Deterministic synthetic params with PyTorch-like shapes/init scales."""
    ks = jax.random.split(key, 8)
    u = lambda k, shape, bound: jax.random.uniform(
        k, shape, jnp.float32, -bound, bound)
    kc = 1.0 / jnp.sqrt(input_size * 3.0)
    kl = 1.0 / jnp.sqrt(float(hidden_size))
    return {
        "conv_w": u(ks[0], (hidden_size, input_size, 3), kc),
        "conv_b": u(ks[1], (hidden_size,), kc),
        "w_ih":   u(ks[2], (4 * hidden_size, hidden_size), kl),
        "w_hh":   u(ks[3], (4 * hidden_size, hidden_size), kl),
        "b_ih":   u(ks[4], (4 * hidden_size,), kl),
        "b_hh":   u(ks[5], (4 * hidden_size,), kl),
        "fc_w":   u(ks[6], (output_size, hidden_size), kl),
        "fc_b":   u(ks[7], (output_size,), kl),
    }


def reference_forward(x, params):
    """Pure-JAX reference mirroring the PyTorch forward exactly
    (MaxPool1d(kernel_size=3, stride=1) as in the module definition)."""
    conv_w, conv_b = params["conv_w"], params["conv_b"]
    xt = jnp.transpose(x, (0, 2, 1))                 # (B, C, S)
    B, C, S = xt.shape
    H, _, K = conv_w.shape
    Lc = S - K + 1
    conv = jnp.zeros((B, H, Lc), jnp.float32)
    for k in range(K):
        conv = conv + jnp.einsum("bcl,hc->bhl", xt[:, :, k:k + Lc], conv_w[:, :, k])
    conv = jnp.maximum(conv + conv_b[None, :, None], 0.0)
    Lp = Lc - 2
    pooled = jnp.maximum(
        jnp.maximum(conv[:, :, 0:Lp], conv[:, :, 1:Lp + 1]), conv[:, :, 2:Lp + 2])
    pooled = jnp.transpose(pooled, (0, 2, 1))        # (B, Lp, H)

    w_ih, w_hh = params["w_ih"], params["w_hh"]
    b = params["b_ih"] + params["b_hh"]
    h = jnp.zeros((B, H), jnp.float32)
    c = jnp.zeros((B, H), jnp.float32)
    for t in range(Lp):
        g = pooled[:, t, :] @ w_ih.T + h @ w_hh.T + b
        i_g = jax.nn.sigmoid(g[:, :H])
        f_g = jax.nn.sigmoid(g[:, H:2 * H])
        g_g = jnp.tanh(g[:, 2 * H:3 * H])
        o_g = jax.nn.sigmoid(g[:, 3 * H:])
        c = f_g * c + i_g * g_g
        h = o_g * jnp.tanh(c)
    return h @ params["fc_w"].T + params["fc_b"]


if __name__ == "__main__":
    # Small shapes implied by the module: (batch, seq, input_size) input.
    batch, seq_len, input_size = 2, 8, 4
    hidden_size, output_size = 32, 4

    key = jax.random.PRNGKey(0)
    kx, kp = jax.random.split(key)
    x = jax.random.normal(kx, (batch, seq_len, input_size), jnp.float32)
    params = init_params(kp, input_size, hidden_size, output_size)

    out = waterlevel_forward(x, params)
    out = jax.block_until_ready(out)

    ref = reference_forward(x, params)
    assert out.shape == (batch, output_size)
    assert jnp.allclose(out, ref, atol=1e-4, rtol=1e-4), (out, ref)

    print("KERNEL_OK")
</pallas_src>

<mosaic_0001>
module attributes {stable_mosaic.version = 11 : i64} {
  func.func @waterlevel_kernel(%arg0: memref<12x12xf32, #tpu.memory_space<vmem>>, %arg1: memref<12x32xf32, #tpu.memory_space<vmem>>, %arg2: memref<1x32xf32, #tpu.memory_space<vmem>>, %arg3: memref<32x128xf32, #tpu.memory_space<vmem>>, %arg4: memref<32x128xf32, #tpu.memory_space<vmem>>, %arg5: memref<1x128xf32, #tpu.memory_space<vmem>>, %arg6: memref<32x4xf32, #tpu.memory_space<vmem>>, %arg7: memref<1x4xf32, #tpu.memory_space<vmem>>, %arg8: memref<2x4xf32, #tpu.memory_space<vmem>>) attributes {dimension_semantics = [], scalar_prefetch = 0 : i64, scratch_operands = 0 : i64, tpu.core_type = #tpu.core_type<tc>} {
    %c0 = arith.constant 0 : index
    %c0_0 = arith.constant 0 : index
    %0 = vector.load %arg0[%c0, %c0_0] : memref<12x12xf32, #tpu.memory_space<vmem>>, vector<12x12xf32>
    %c0_1 = arith.constant 0 : index
    %c0_2 = arith.constant 0 : index
    %1 = vector.load %arg1[%c0_1, %c0_2] : memref<12x32xf32, #tpu.memory_space<vmem>>, vector<12x32xf32>
    %cst = arith.constant dense<0.000000e+00> : vector<12x32xf32>
    %2 = tpu.matmul %0, %1, %cst {dimension_numbers = #tpu.dot_dimension_numbers<[1], [0], [0], [1], [0, 0, 1, 1], [], []>} : vector<12x12xf32>, vector<12x32xf32>, vector<12x32xf32> -> vector<12x32xf32>
    %c0_3 = arith.constant 0 : index
    %c0_4 = arith.constant 0 : index
    %3 = vector.load %arg2[%c0_3, %c0_4] : memref<1x32xf32, #tpu.memory_space<vmem>>, vector<1x32xf32>
    %4 = vector.broadcast %3 : vector<1x32xf32> to vector<12x32xf32>
    %5 = arith.addf %2, %4 : vector<12x32xf32>
    %cst_5 = arith.constant 0.000000e+00 : f32
    %6 = vector.broadcast %cst_5 : f32 to vector<12x32xf32>
    %7 = arith.maximumf %5, %6 : vector<12x32xf32>
    %8 = vector.shape_cast %7 : vector<12x32xf32> to vector<2x6x32xf32>
    %9 = vector.extract_strided_slice %8 {offsets = [0, 0, 0], sizes = [2, 4, 32], strides = [1, 1, 1]} : vector<2x6x32xf32> to vector<2x4x32xf32>
    %10 = vector.extract_strided_slice %8 {offsets = [0, 1, 0], sizes = [2, 4, 32], strides = [1, 1, 1]} : vector<2x6x32xf32> to vector<2x4x32xf32>
    %11 = arith.maximumf %9, %10 : vector<2x4x32xf32>
    %12 = vector.extract_strided_slice %8 {offsets = [0, 2, 0], sizes = [2, 4, 32], strides = [1, 1, 1]} : vector<2x6x32xf32> to vector<2x4x32xf32>
    %13 = arith.maximumf %11, %12 : vector<2x4x32xf32>
    %14 = vector.shape_cast %13 : vector<2x4x32xf32> to vector<8x32xf32>
    %c0_6 = arith.constant 0 : index
    %c0_7 = arith.constant 0 : index
    %15 = vector.load %arg3[%c0_6, %c0_7] : memref<32x128xf32, #tpu.memory_space<vmem>>, vector<32x128xf32>
    %cst_8 = arith.constant dense<0.000000e+00> : vector<8x128xf32>
    %16 = tpu.matmul %14, %15, %cst_8 {dimension_numbers = #tpu.dot_dimension_numbers<[1], [0], [0], [1], [0, 0, 1, 1], [], []>} : vector<8x32xf32>, vector<32x128xf32>, vector<8x128xf32> -> vector<8x128xf32>
    %c0_9 = arith.constant 0 : index
    %c0_10 = arith.constant 0 : index
    %17 = vector.load %arg5[%c0_9, %c0_10] : memref<1x128xf32, #tpu.memory_space<vmem>>, vector<1x128xf32>
    %18 = vector.broadcast %17 : vector<1x128xf32> to vector<8x128xf32>
    %19 = arith.addf %16, %18 : vector<8x128xf32>
    %20 = vector.shape_cast %19 : vector<8x128xf32> to vector<2x4x128xf32>
    %c0_11 = arith.constant 0 : index
    %c0_12 = arith.constant 0 : index
    %21 = vector.load %arg4[%c0_11, %c0_12] : memref<32x128xf32, #tpu.memory_space<vmem>>, vector<32x128xf32>
    %22 = tpu.iota {dimensions = array<i32: 1>} : vector<2x128xi32>
    %c64_i32 = arith.constant 64 : i32
    %23 = vector.broadcast %c64_i32 : i32 to vector<2x128xi32>
    %24 = arith.cmpi sge, %22, %23 : vector<2x128xi32>
    %c96_i32 = arith.constant 96 : i32
    %25 = vector.broadcast %c96_i32 : i32 to vector<2x128xi32>
    %26 = arith.cmpi slt, %22, %25 : vector<2x128xi32>
    %27 = arith.andi %24, %26 : vector<2x128xi1>
    %cst_13 = arith.constant 0.000000e+00 : f32
    %28 = vector.broadcast %cst_13 : f32 to vector<2x32xf32>
    %cst_14 = arith.constant 0.000000e+00 : f32
    %29 = vector.broadcast %cst_14 : f32 to vector<2x32xf32>
    %30 = vector.extract_strided_slice %20 {offsets = [0, 0, 0], sizes = [2, 1, 128], strides = [1, 1, 1]} : vector<2x4x128xf32> to vector<2x1x128xf32>
    %31 = vector.shape_cast %30 : vector<2x1x128xf32> to vector<2x128xf32>
    %cst_15 = arith.constant dense<0.000000e+00> : vector<2x128xf32>
    %32 = tpu.matmul %28, %21, %cst_15 {dimension_numbers = #tpu.dot_dimension_numbers<[1], [0], [0], [1], [0, 0, 1, 1], [], []>} : vector<2x32xf32>, vector<32x128xf32>, vector<2x128xf32> -> vector<2x128xf32>
    %33 = arith.addf %31, %32 : vector<2x128xf32>
    %34 = math.tanh %33 : vector<2x128xf32>
    %35 = arith.negf %33 : vector<2x128xf32>
    %36 = math.exp %35 : vector<2x128xf32>
    %cst_16 = arith.constant 1.000000e+00 : f32
    %37 = vector.broadcast %cst_16 : f32 to vector<2x128xf32>
    %38 = arith.addf %37, %36 : vector<2x128xf32>
    %39 = arith.divf %37, %38 : vector<2x128xf32>
    %40 = arith.select %27, %34, %39 : vector<2x128xi1>, vector<2x128xf32>
    %41 = vector.extract_strided_slice %40 {offsets = [0, 0], sizes = [2, 32], strides = [1, 1]} : vector<2x128xf32> to vector<2x32xf32>
    %42 = vector.extract_strided_slice %40 {offsets = [0, 32], sizes = [2, 32], strides = [1, 1]} : vector<2x128xf32> to vector<2x32xf32>
    %43 = vector.extract_strided_slice %40 {offsets = [0, 64], sizes = [2, 32], strides = [1, 1]} : vector<2x128xf32> to vector<2x32xf32>
    %44 = vector.extract_strided_slice %40 {offsets = [0, 96], sizes = [2, 32], strides = [1, 1]} : vector<2x128xf32> to vector<2x32xf32>
    %45 = arith.mulf %42, %29 : vector<2x32xf32>
    %46 = arith.mulf %41, %43 : vector<2x32xf32>
    %47 = arith.addf %45, %46 : vector<2x32xf32>
    %48 = math.tanh %47 : vector<2x32xf32>
    %49 = arith.mulf %44, %48 : vector<2x32xf32>
    %50 = vector.extract_strided_slice %20 {offsets = [0, 1, 0], sizes = [2, 1, 128], strides = [1, 1, 1]} : vector<2x4x128xf32> to vector<2x1x128xf32>
    %51 = vector.shape_cast %50 : vector<2x1x128xf32> to vector<2x128xf32>
    %cst_17 = arith.constant dense<0.000000e+00> : vector<2x128xf32>
    %52 = tpu.matmul %49, %21, %cst_17 {dimension_numbers = #tpu.dot_dimension_numbers<[1], [0], [0], [1], [0, 0, 1, 1], [], []>} : vector<2x32xf32>, vector<32x128xf32>, vector<2x128xf32> -> vector<2x128xf32>
    %53 = arith.addf %51, %52 : vector<2x128xf32>
    %54 = math.tanh %53 : vector<2x128xf32>
    %55 = arith.negf %53 : vector<2x128xf32>
    %56 = math.exp %55 : vector<2x128xf32>
    %cst_18 = arith.constant 1.000000e+00 : f32
    %57 = vector.broadcast %cst_18 : f32 to vector<2x128xf32>
    %58 = arith.addf %57, %56 : vector<2x128xf32>
    %59 = arith.divf %57, %58 : vector<2x128xf32>
    %60 = arith.select %27, %54, %59 : vector<2x128xi1>, vector<2x128xf32>
    %61 = vector.extract_strided_slice %60 {offsets = [0, 0], sizes = [2, 32], strides = [1, 1]} : vector<2x128xf32> to vector<2x32xf32>
    %62 = vector.extract_strided_slice %60 {offsets = [0, 32], sizes = [2, 32], strides = [1, 1]} : vector<2x128xf32> to vector<2x32xf32>
    %63 = vector.extract_strided_slice %60 {offsets = [0, 64], sizes = [2, 32], strides = [1, 1]} : vector<2x128xf32> to vector<2x32xf32>
    %64 = vector.extract_strided_slice %60 {offsets = [0, 96], sizes = [2, 32], strides = [1, 1]} : vector<2x128xf32> to vector<2x32xf32>
    %65 = arith.mulf %62, %47 : vector<2x32xf32>
    %66 = arith.mulf %61, %63 : vector<2x32xf32>
    %67 = arith.addf %65, %66 : vector<2x32xf32>
    %68 = math.tanh %67 : vector<2x32xf32>
    %69 = arith.mulf %64, %68 : vector<2x32xf32>
    %70 = vector.extract_strided_slice %20 {offsets = [0, 2, 0], sizes = [2, 1, 128], strides = [1, 1, 1]} : vector<2x4x128xf32> to vector<2x1x128xf32>
    %71 = vector.shape_cast %70 : vector<2x1x128xf32> to vector<2x128xf32>
    %cst_19 = arith.constant dense<0.000000e+00> : vector<2x128xf32>
    %72 = tpu.matmul %69, %21, %cst_19 {dimension_numbers = #tpu.dot_dimension_numbers<[1], [0], [0], [1], [0, 0, 1, 1], [], []>} : vector<2x32xf32>, vector<32x128xf32>, vector<2x128xf32> -> vector<2x128xf32>
    %73 = arith.addf %71, %72 : vector<2x128xf32>
    %74 = math.tanh %73 : vector<2x128xf32>
    %75 = arith.negf %73 : vector<2x128xf32>
    %76 = math.exp %75 : vector<2x128xf32>
    %cst_20 = arith.constant 1.000000e+00 : f32
    %77 = vector.broadcast %cst_20 : f32 to vector<2x128xf32>
    %78 = arith.addf %77, %76 : vector<2x128xf32>
    %79 = arith.divf %77, %78 : vector<2x128xf32>
    %80 = arith.select %27, %74, %79 : vector<2x128xi1>, vector<2x128xf32>
    %81 = vector.extract_strided_slice %80 {offsets = [0, 0], sizes = [2, 32], strides = [1, 1]} : vector<2x128xf32> to vector<2x32xf32>
    %82 = vector.extract_strided_slice %80 {offsets = [0, 32], sizes = [2, 32], strides = [1, 1]} : vector<2x128xf32> to vector<2x32xf32>
    %83 = vector.extract_strided_slice %80 {offsets = [0, 64], sizes = [2, 32], strides = [1, 1]} : vector<2x128xf32> to vector<2x32xf32>
    %84 = vector.extract_strided_slice %80 {offsets = [0, 96], sizes = [2, 32], strides = [1, 1]} : vector<2x128xf32> to vector<2x32xf32>
    %85 = arith.mulf %82, %67 : vector<2x32xf32>
    %86 = arith.mulf %81, %83 : vector<2x32xf32>
    %87 = arith.addf %85, %86 : vector<2x32xf32>
    %88 = math.tanh %87 : vector<2x32xf32>
    %89 = arith.mulf %84, %88 : vector<2x32xf32>
    %90 = vector.extract_strided_slice %20 {offsets = [0, 3, 0], sizes = [2, 1, 128], strides = [1, 1, 1]} : vector<2x4x128xf32> to vector<2x1x128xf32>
    %91 = vector.shape_cast %90 : vector<2x1x128xf32> to vector<2x128xf32>
    %cst_21 = arith.constant dense<0.000000e+00> : vector<2x128xf32>
    %92 = tpu.matmul %89, %21, %cst_21 {dimension_numbers = #tpu.dot_dimension_numbers<[1], [0], [0], [1], [0, 0, 1, 1], [], []>} : vector<2x32xf32>, vector<32x128xf32>, vector<2x128xf32> -> vector<2x128xf32>
    %93 = arith.addf %91, %92 : vector<2x128xf32>
    %94 = math.tanh %93 : vector<2x128xf32>
    %95 = arith.negf %93 : vector<2x128xf32>
    %96 = math.exp %95 : vector<2x128xf32>
    %cst_22 = arith.constant 1.000000e+00 : f32
    %97 = vector.broadcast %cst_22 : f32 to vector<2x128xf32>
    %98 = arith.addf %97, %96 : vector<2x128xf32>
    %99 = arith.divf %97, %98 : vector<2x128xf32>
    %100 = arith.select %27, %94, %99 : vector<2x128xi1>, vector<2x128xf32>
    %101 = vector.extract_strided_slice %100 {offsets = [0, 0], sizes = [2, 32], strides = [1, 1]} : vector<2x128xf32> to vector<2x32xf32>
    %102 = vector.extract_strided_slice %100 {offsets = [0, 32], sizes = [2, 32], strides = [1, 1]} : vector<2x128xf32> to vector<2x32xf32>
    %103 = vector.extract_strided_slice %100 {offsets = [0, 64], sizes = [2, 32], strides = [1, 1]} : vector<2x128xf32> to vector<2x32xf32>
    %104 = vector.extract_strided_slice %100 {offsets = [0, 96], sizes = [2, 32], strides = [1, 1]} : vector<2x128xf32> to vector<2x32xf32>
    %105 = arith.mulf %102, %87 : vector<2x32xf32>
    %106 = arith.mulf %101, %103 : vector<2x32xf32>
    %107 = arith.addf %105, %106 : vector<2x32xf32>
    %108 = math.tanh %107 : vector<2x32xf32>
    %109 = arith.mulf %104, %108 : vector<2x32xf32>
    %c0_23 = arith.constant 0 : index
    %c0_24 = arith.constant 0 : index
    %110 = vector.load %arg6[%c0_23, %c0_24] : memref<32x4xf32, #tpu.memory_space<vmem>>, vector<32x4xf32>
    %cst_25 = arith.constant dense<0.000000e+00> : vector<2x4xf32>
    %111 = tpu.matmul %109, %110, %cst_25 {dimension_numbers = #tpu.dot_dimension_numbers<[1], [0], [0], [1], [0, 0, 1, 1], [], []>} : vector<2x32xf32>, vector<32x4xf32>, vector<2x4xf32> -> vector<2x4xf32>
    %c0_26 = arith.constant 0 : index
    %c0_27 = arith.constant 0 : index
    %112 = vector.load %arg7[%c0_26, %c0_27] : memref<1x4xf32, #tpu.memory_space<vmem>>, vector<1x4xf32>
    %113 = vector.broadcast %112 : vector<1x4xf32> to vector<2x4xf32>
    %114 = arith.addf %111, %113 : vector<2x4xf32>
    %c0_28 = arith.constant 0 : index
    %c0_29 = arith.constant 0 : index
    %115 = vector.load %arg8[%c0_28, %c0_29] : memref<2x4xf32, #tpu.memory_space<vmem>>, vector<2x4xf32>
    tpu.vector_store %arg8[%c0_28, %c0_29], %114 {strides = array<i32>} : memref<2x4xf32, #tpu.memory_space<vmem>>, vector<2x4xf32>,
    return
  }
}

</mosaic_0001>

<bundles_post_ra>
// kernel: tpu_custom_call.1
= control target key start
LH: loop header
LB: loop body
LE: loop exit
PB: predicated region body
PF: predicated region fallthrough
CT: control target
= control target key end

     0   :  { %13 = vsyncpa [#allocation3], 0  ;;  %s1043_s0 = inlined_call_operand.hbm [shape: f32[12,12], index: 0, kind: input, shape index: {}]   ;;  %s1044_s1 = inlined_call_operand.hbm [shape: f32[12,32], index: 1, kind: input, shape index: {}]   ;;  %s1045_s2 = inlined_call_operand.vmem [shape: f32[1,32], index: 2, kind: input, shape index: {}]   ;;  %s1046_s3 = inlined_call_operand.vmem [shape: f32[32,128], index: 3, kind: input, shape index: {}]   ;;  %s1047_s4 = inlined_call_operand.hbm [shape: f32[32,128], index: 4, kind: input, shape index: {}]   ;;  %s1048_s5 = inlined_call_operand.vmem [shape: f32[1,128], index: 5, kind: input, shape index: {}]   ;;  %s1049_s6 = inlined_call_operand.vmem [shape: f32[32,4], index: 6, kind: input, shape index: {}]   ;;  %s1050_s7 = inlined_call_operand.vmem [shape: f32[1,4], index: 7, kind: input, shape index: {}]   ;;  %s1051_s8 = inlined_call_operand.hbm [shape: f32[2,4], index: 8, kind: output, shape index: {}]  }
   0x1   :  { %14 = vsyncpa [#allocation6], 0 }
   0x2   :  { %15 = vsyncpa [#allocation4], 0  ;;  %s33_s29 = sshll.u32 %s1044_s1, 4  ;;  %s865_s30 = smov [#allocation5]   ;;  %s34_s29 = int_to_ptr.hbm [resolvable:$true] %s33_s29 }
   0x3   :  { %s35_s9 = sshll.u32 %s865_s30, 4  ;;  %s20_s12 = sshll.u32 %s1043_s0, 4  ;;  %s36_s9 = int_to_ptr.vmem [resolvable:$true] %s35_s9  ;;  %s21_s12 = int_to_ptr.hbm [resolvable:$true] %s20_s12 }
   0x4   :  { %s866_s13 = smov 128   ;;  %s867_s14 = smov 8  }
   0x5   :  { %41 = dma.hbm_to_vmem [thread:$0]  %s34_s29, 256, %s36_s9, [#allocation6], %s866_s13, %s866_s13, %s867_s14  }
   0x6   :  { %s868_s15 = smov [#allocation2]   ;;  %s50_s19 = sshll.u32 %s1047_s4, 4  ;;  %s51_s19 = int_to_ptr.hbm [resolvable:$true] %s50_s19 }
   0x7   :  { %s22_s16 = sshll.u32 %s868_s15, 4  ;;  %s869_s1 = smov [#allocation7]   ;;  %s23_s16 = int_to_ptr.vmem [resolvable:$true] %s22_s16 }
   0x8   :  { %28 = dma.hbm_to_vmem [thread:$0]  %s21_s12, 256, %s23_s16, [#allocation3], %s866_s13, %s866_s13, %s867_s14  }
   0x9   :  { %s52_s20 = sshll.u32 %s869_s1, 4  ;;  %s53_s20 = int_to_ptr.vmem [resolvable:$true] %s52_s20 }
   0xa   :  { %58 = dma.hbm_to_vmem [thread:$0]  %s51_s19, 512, %s53_s20, [#allocation6], %s866_s13, %s866_s13, %s867_s14  }
   0xb   :  { %859 = dma.done.wait [#allocation3], 256  }
   0xc   :  { %860 = vsyncadd [#allocation3], 4294967040 }
   0xd   :  { %861 = dma.done.wait [#allocation6], 768  }
   0xe   :  { %862 = vsyncadd [#allocation6], 4294966528  ;;  %vm92_vm0 = vcmask 1043456   ;;  %v80_v0 = vld [vmem:[#allocation5 + $0x8] sm:$0xf]  ;;  %v79_v1 = vld [vmem:[#allocation5] sm:$0xff]  ;;  %v214_v61 = vlaneseq }
   0xf   :  { %677 = vmatpush.msk.msra.mxu0 %vm92_vm0, %v80_v0  ;;  %v77_v2 = vld [vmem:[#allocation2] sm:$0xff]  ;;  %vm85_vm1 = vcmask 97280   ;;  %v78_v3 = vld [vmem:[#allocation2 + $0x8] sm:$0xf]  ;;  %v213_v4 = vld [vmem:[#allocation7 + $0x18] sm:$0xff]  ;;  %v870_v11 = vmov 0.0  }
  0x10   :  { %234 = vmatpush.msra.mxu2 %v213_v4  ;;  %336 = vmatpush.msra.mxu3 %v213_v4  ;;  %v212_v5 = vld [vmem:[#allocation7 + $0x10] sm:$0xff]  ;;  %v211_v7 = vld [vmem:[#allocation7 + $0x8] sm:$0xff]  ;;  %v210_v9 = vld [vmem:[#allocation7] sm:$0xff]  ;;  %vm131_vm2 = vcmask 1040384   ;;  %vm132_vm3 = vcmask 1042434   ;;  %vm134_vm5 = vcmask 1044484  }
  0x11   :  { %111 = vmatpush.msra.mxu0 %v79_v1  ;;  %v167_v6 = vld [vmem:[%s1046_s3 + $0x18] sm:$0xff]  ;;  %v166_v8 = vld [vmem:[%s1046_s3 + $0x10] sm:$0xff]  ;;  %v165_v10 = vld [vmem:[%s1046_s3 + $0x8] sm:$0xff]  ;;  %vm136_vm7 = vcmask 1046534   ;;  %vm184_vm9 = vcmask 261120   ;;  %s872_s29 = smov 32  }
  0x12   :  { %678 = vmatmul.msk.f32.vlgmr.msra.gmra.mxu0 %vm85_vm1, %v77_v2  ;;  %235 = vmatpush.msra.mxu2 %v212_v5  ;;  %v164_v12 = vld [vmem:[%s1046_s3] sm:$0xff]  ;;  %vm133_vm4 = vmor %vm131_vm2, %vm132_vm3  ;;  %s873_s18 = smov [#allocation8]   ;;  %s666_s0 = sshll.u32 %s1051_s8, 4  ;;  %s667_s0 = int_to_ptr.hbm [resolvable:$true] %s666_s0 }
  0x13   :  { %337 = vmatpush.msra.mxu3 %v212_v5  ;;  %199 = vmatpush.msra.mxu1 %v167_v6  ;;  %v704_v13 = vld [vmem:[%s1045_s2] ss:$0 sm:$0xff]  ;;  %vm135_vm6 = vmor %vm133_vm4, %vm134_vm5  ;;  %vm292_vm4 = vcmask 1041409   ;;  %s664_s19 = sshll.u32 %s873_s18, 4  ;;  %s665_s19 = int_to_ptr.vmem [resolvable:$true] %s664_s19 }
  0x14   :  { %236 = vmatpush.msra.mxu2 %v211_v7  ;;  %vm943_vm8 = vmor %vm135_vm6, %vm136_vm7  ;;  %v705_v46 = vld [vmem:[%s1048_s5] ss:$0 sm:$0xff]  ;;  %s871_s5 = smov 64  }
  0x15   :  { %338 = vmatpush.msra.mxu3 %v211_v7  ;;  %200 = vmatpush.msra.mxu1 %v166_v8 }
  0x16   :  { %237 = vmatpush.msra.mxu2 %v210_v9 }
  0x17   :  { %238 = vmatmul.f32.vlgmr.msra.gmra.mxu2 %v870_v11  ;;  %339 = vmatpush.msra.mxu3 %v210_v9 }
  0x18   :  { %201 = vmatpush.msra.mxu1 %v165_v10  ;;  %539 = vmatpush.msrb.mxu2 %v213_v4 }
  0x1a   :  { %679 = vmatmul.msk.f32.gmra.mxu0 %vm85_vm1, %v78_v3  ;;  %202 = vmatpush.msra.mxu1 %v164_v12  ;;  %v215_v3 = vand.u32 127, %v214_v61 }
  0x1b   :  { %540 = vmatpush.msrb.mxu2 %v212_v5 }
  0x1c   :  { %437 = vmatpush.msrb.mxu1 %v213_v4  ;;  %vm216_vm13 = vcmp.ge.s32.totalorder %v215_v3, 64  ;;  %vm217_vm0 = vcmp.lt.s32.totalorder %v215_v3, 96 }
  0x1d   :  { %541 = vmatpush.msrb.mxu2 %v211_v7  ;;  %vm967_vm5 = vmand %vm216_vm13, %vm217_vm0 }
  0x1e   :  { %438 = vmatpush.msrb.mxu1 %v212_v5 }
  0x1f   :  { %542 = vmatpush.msrb.mxu2 %v210_v9 }
  0x20   :  { %439 = vmatpush.msrb.mxu1 %v211_v7 }
  0x22   :  { %440 = vmatpush.msrb.mxu1 %v210_v9 }
  0x8f   :  { %v113_v14 = vpop.f32.mrf.mxu0 }
  0x90   :  { %v114_v15 = vadd.f32 %v704_v13, %v113_v14 }
  0x92   :  { %v119_v16 = vmax.f32 %v114_v15, 0.0 }
  0x94   :  { %v123_v17 = vrot.slane %v119_v16, 2  ;;  %v124_v18 = vrot.slane %v119_v16, 4  ;;  %v680_v20 = vrot.slane %v119_v16, 9  ;;  %v125_v23 = vrot.slane %v119_v16, 6 }
  0x96   :  { %v140_v21 = vrot.slane %v123_v17, 7  ;;  %v143_v26 = vrot.slane %v124_v18, 7  ;;  %v681_v34 = vrot.slane %v125_v23, 9 }
  0x97   :  { %v116_v22 = vpop.f32.mrf.mxu0 }
  0x98   :  { %v141_v24 = vsel %vm943_vm8, %v680_v20, %v140_v21  ;;  %v142_v25 = vrot.slane %v140_v21, 2  ;;  %v117_v27 = vadd.f32 %v704_v13, %v116_v22  ;;  %v626_v22 = vld [vmem:[%s1049_s6 + $0x10] sm:$0xff] }
  0x99   :  { %v156_v28 = vmax.f32 %v119_v16, %v141_v24 }
  0x9a   :  { %v144_v29 = vsel %vm943_vm8, %v142_v25, %v143_v26  ;;  %v120_v30 = vmax.f32 %v117_v27, 0.0  ;;  %v239_v47 = vpop.f32.mrf.mxu2 }
  0x9b   :  { %v157_v31 = vmax.f32 %v123_v17, %v144_v29  ;;  %v160_v32 = vmax.f32 %v156_v28, %v123_v17  ;;  %v243_v50 = vrot.slane %v239_v47, 1 }
  0x9c   :  { %v126_v33 = vrot.slane %v120_v30, 2  ;;  %v147_v35 = vrot.slane %v120_v30, 7 }
  0x9d   :  { %v161_v36 = vmax.f32 %v157_v31, %v124_v18  ;;  %176 = vst [vmem:[#allocation1] ss:$4 sm:$0xff] %v160_v32 }
  0x9e   :  { %v148_v37 = vsel %vm943_vm8, %v681_v34, %v147_v35  ;;  %v149_v38 = vrot.slane %v147_v35, 2  ;;  %v150_v39 = vrot.slane %v126_v33, 7 }
  0x9f   :  { %178 = vst [vmem:[#allocation1 + $0x1] ss:$4 sm:$0xff] %v161_v36  ;;  %v158_v40 = vmax.f32 %v125_v23, %v148_v37 }
  0xa0   :  { %v151_v41 = vsel %vm943_vm8, %v149_v38, %v150_v39 }
  0xa1   :  { %v159_v42 = vmax.f32 %v120_v30, %v151_v41  ;;  %v162_v43 = vmax.f32 %v158_v40, %v120_v30 }
  0xa3   :  { %v163_v44 = vmax.f32 %v159_v42, %v126_v33  ;;  %180 = vst [vmem:[#allocation1 + $0x2] ss:$4 sm:$0xff] %v162_v43 }
  0xa5   :  { %182 = vst [vmem:[#allocation1 + $0x3] ss:$4 sm:$0xff] %v163_v44 }
  0xac   :  { %v183_v45 = vld.sshfl [vmem:[#allocation1] sm:$0xff pattern:$0x73625140] }
  0xad   :  { %682 = vmatmul.msk.f32.vlgmr.msra.gmra.mxu1 %vm184_vm9, %v183_v45 }
 0x12a   :  { %v204_v48 = vpop.f32.mrf.mxu1 }
 0x12b   :  { %v959_v49 = vadd.f32 %v705_v46, %v204_v48 }
 0x12d   :  { %v962_v51 = vrot.slane %v959_v49, 4  ;;  %v246_v52 = vadd.f32 %v239_v47, %v959_v49 }
 0x12f   :  { %v247_v53 = vadd.f32 %v243_v50, %v962_v51  ;;  %v683_v54 = vmul.f32 -1.442695, %v246_v52 }
 0x131   :  { %v684_v55 = vmul.f32 -1.442695, %v247_v53  ;;  %707 = vpow2.f32 %v683_v54 }
 0x133   :  { %709 = vpow2.f32 %v684_v55 }
 0x137   :  { %v708_v56 = vpop.eup %707 }
 0x138   :  { %v256_v58 = vadd.f32 1.0, %v708_v56 }
 0x139   :  { %v710_v57 = vpop.eup %709 }
 0x13a   :  { %v257_v59 = vadd.f32 1.0, %v710_v57  ;;  %711 = vrcp.f32 %v256_v58  ;;  %v269_v4 = vand.u32 2147483648, %v256_v58  ;;  %v267_v6 = vand.u32 2147483647, %v256_v58 }
 0x13b   :  { %vm263_vm12 = vweird.f32 %v256_v58 }
 0x13c   :  { %713 = vrcp.f32 %v257_v59  ;;  %v284_v7 = vand.u32 2147483648, %v257_v59  ;;  %v282_v9 = vand.u32 2147483647, %v257_v59  ;;  %v270_v12 = vor.u32 1.1754944e-38, %v269_v4 }
 0x13d   :  { %715 = vtanh.f32 %v247_v53  ;;  %vm278_vm15 = vweird.f32 %v257_v59  ;;  %vm268_vm1 = vcmp.eq.f32.partialorder %v267_v6, 8.507059e+37 }
 0x13e   :  { %717 = vtanh.f32 %v246_v52  ;;  %v285_v16 = vor.u32 1.1754944e-38, %v284_v7  ;;  %vm283_vm3 = vcmp.eq.f32.partialorder %v282_v9, 8.507059e+37 }
 0x140   :  { %v712_v60 = vpop.eup %711 }
 0x141   :  { %v259_v63 = vmul.f32 %v712_v60, %v256_v58  ;;  %vm264_vm10 = vweird.f32 %v712_v60 }
 0x142   :  { %v714_v62 = vpop.eup %713  ;;  %vm265_vm14 = vmor %vm263_vm12, %vm264_vm10 }
 0x143   :  { %v274_v0 = vmul.f32 %v714_v62, %v257_v59  ;;  %v260_v1 = vsub.f32 1.0, %v259_v63  ;;  %vm279_vm11 = vweird.f32 %v714_v62  ;;  %v716_v10 = vpop.eup %715 }
 0x144   :  { %v718_v14 = vpop.eup %717  ;;  %vm280_vm2 = vmor %vm278_vm15, %vm279_vm11  ;;  %v291_v17 = vperm.slane %v716_v10, 0 }
 0x145   :  { %v275_v2 = vsub.f32 1.0, %v274_v0  ;;  %v261_v5 = vmul.f32 %v712_v60, %v260_v1  ;;  %v290_v21 = vperm.slane %v718_v14, 0 }
 0x147   :  { %v276_v8 = vmul.f32 %v714_v62, %v275_v2  ;;  %v262_v11 = vadd.f32 %v712_v60, %v261_v5  ;;  %v293_v25 = vsel %vm292_vm4, %v291_v17, %v290_v21 }
 0x149   :  { %v277_v13 = vadd.f32 %v714_v62, %v276_v8  ;;  %v266_v15 = vsel %vm265_vm14, %v712_v60, %v262_v11 }
 0x14a   :  { %v271_v18 = vsel %vm268_vm1, %v270_v12, %v266_v15 }
 0x14b   :  { %v281_v19 = vsel %vm280_vm2, %v714_v62, %v277_v13  ;;  %v297_v23 = vperm.slane %v271_v18, 0 }
 0x14c   :  { %v286_v20 = vsel %vm283_vm3, %v285_v16, %v281_v19 }
 0x14d   :  { %v298_v24 = vperm.slane %v286_v20, 0 }
 0x14f   :  { %v299_v26 = vsel %vm292_vm4, %v298_v24, %v297_v23 }
 0x150   :  { %v301_v27 = vsel %vm967_vm5, %v293_v25, %v299_v26 }
 0x151   :  { %304 = vrot.lane.b32.xlu0 %v301_v27, %s871_s5  ;;  %v302_v30 = vmul.f32 0.0, %v301_v27 }
 0x1c3   :  { %v305_v28 = vpop.permute.xlu0 %304 }
 0x1c4   :  { %v307_v29 = vmul.f32 %v305_v28, %v301_v27 }
 0x1c6   :  { %309 = vrot.lane.b32.xlu0 %v307_v29, %s872_s29 }
 0x238   :  { %v310_v31 = vpop.permute.xlu0 %309 }
 0x239   :  { %v977_v32 = vadd.f32 %v310_v31, %v302_v30 }
 0x23b   :  { %719 = vtanh.f32 %v977_v32 }
 0x241   :  { %v720_v33 = vpop.eup %719 }
 0x242   :  { %315 = vrot.lane.b32.xlu1 %v720_v33, %s871_s5 }
 0x2b4   :  { %v316_v34 = vpop.permute.xlu1 %315 }
 0x2b5   :  { %v318_v35 = vmul.f32 %v316_v34, %v301_v27 }
 0x2b7   :  { %320 = vrot.lane.b32.xlu1 %v318_v35, %s872_s29 }
 0x329   :  { %v321_v36 = vpop.permute.xlu1 %320 }
 0x32a   :  { %685 = vmatmul.msk.f32.vlgmr.msra.gmra.mxu3 %vm184_vm9, %v321_v36 }
 0x3ad   :  { %v341_v37 = vpop.f32.mrf.mxu3 }
 0x3ae   :  { %v345_v38 = vrot.slane %v341_v37, 7  ;;  %v349_v39 = vadd.f32 %v341_v37, %v962_v51 }
 0x3b0   :  { %v348_v40 = vadd.f32 %v345_v38, %v959_v49  ;;  %v687_v41 = vmul.f32 -1.442695, %v349_v39 }
 0x3b2   :  { %v686_v42 = vmul.f32 -1.442695, %v348_v40  ;;  %721 = vpow2.f32 %v687_v41 }
 0x3b4   :  { %723 = vpow2.f32 %v686_v42 }
 0x3b8   :  { %v722_v43 = vpop.eup %721 }
 0x3b9   :  { %v359_v45 = vadd.f32 1.0, %v722_v43 }
 0x3ba   :  { %v724_v44 = vpop.eup %723 }
 0x3bb   :  { %v358_v46 = vadd.f32 1.0, %v724_v44  ;;  %725 = vrcp.f32 %v359_v45  ;;  %v386_v55 = vand.u32 2147483648, %v359_v45  ;;  %v384_v58 = vand.u32 2147483647, %v359_v45 }
 0x3bc   :  { %vm380_vm8 = vweird.f32 %v359_v45 }
 0x3bd   :  { %727 = vrcp.f32 %v358_v46  ;;  %v371_v56 = vand.u32 2147483648, %v358_v46  ;;  %v369_v60 = vand.u32 2147483647, %v358_v46  ;;  %vm365_vm10 = vweird.f32 %v358_v46 }
 0x3be   :  { %729 = vtanh.f32 %v348_v40  ;;  %v387_v0 = vor.u32 1.1754944e-38, %v386_v55  ;;  %vm385_vm13 = vcmp.eq.f32.partialorder %v384_v58, 8.507059e+37 }
 0x3bf   :  { %731 = vtanh.f32 %v349_v39  ;;  %v372_v2 = vor.u32 1.1754944e-38, %v371_v56  ;;  %vm370_vm14 = vcmp.eq.f32.partialorder %v369_v60, 8.507059e+37 }
 0x3c1   :  { %v726_v47 = vpop.eup %725 }
 0x3c2   :  { %v376_v50 = vmul.f32 %v726_v47, %v359_v45  ;;  %vm381_vm6 = vweird.f32 %v726_v47 }
 0x3c3   :  { %v728_v48 = vpop.eup %727  ;;  %vm382_vm11 = vmor %vm380_vm8, %vm381_vm6 }
 0x3c4   :  { %v361_v52 = vmul.f32 %v728_v48, %v358_v46  ;;  %v377_v53 = vsub.f32 1.0, %v376_v50  ;;  %vm366_vm7 = vweird.f32 %v728_v48  ;;  %v730_v61 = vpop.eup %729 }
 0x3c5   :  { %v732_v1 = vpop.eup %731  ;;  %vm367_vm12 = vmor %vm365_vm10, %vm366_vm7  ;;  %v392_v4 = vperm.slane %v730_v61, 1 }
 0x3c6   :  { %v362_v54 = vsub.f32 1.0, %v361_v52  ;;  %v378_v57 = vmul.f32 %v726_v47, %v377_v53  ;;  %v393_v8 = vperm.slane %v732_v1, 1 }
 0x3c8   :  { %v363_v59 = vmul.f32 %v728_v48, %v362_v54  ;;  %v379_v62 = vadd.f32 %v726_v47, %v378_v57  ;;  %v394_v11 = vsel %vm292_vm4, %v393_v8, %v392_v4 }
 0x3ca   :  { %v364_v63 = vadd.f32 %v728_v48, %v363_v59  ;;  %v383_v3 = vsel %vm382_vm11, %v726_v47, %v379_v62 }
 0x3cb   :  { %v388_v6 = vsel %vm385_vm13, %v387_v0, %v383_v3 }
 0x3cc   :  { %v368_v5 = vsel %vm367_vm12, %v728_v48, %v364_v63  ;;  %v399_v10 = vperm.slane %v388_v6, 1 }
 0x3cd   :  { %v373_v7 = vsel %vm370_vm14, %v372_v2, %v368_v5 }
 0x3ce   :  { %v398_v9 = vperm.slane %v373_v7, 1 }
 0x3d0   :  { %v400_v12 = vsel %vm292_vm4, %v399_v10, %v398_v9 }
 0x3d1   :  { %v402_v13 = vsel %vm967_vm5, %v394_v11, %v400_v12 }
 0x3d2   :  { %405 = vrot.lane.b32.xlu2 %v402_v13, %s871_s5  ;;  %v403_v16 = vmul.f32 %v402_v13, %v977_v32 }
 0x42c   :  { %v406_v14 = vpop.permute.xlu2 %405 }
 0x42d   :  { %v408_v15 = vmul.f32 %v406_v14, %v402_v13 }
 0x42f   :  { %410 = vrot.lane.b32.xlu2 %v408_v15, %s872_s29 }
 0x489   :  { %v411_v17 = vpop.permute.xlu2 %410 }
 0x48a   :  { %v992_v18 = vadd.f32 %v411_v17, %v403_v16 }
 0x48c   :  { %733 = vtanh.f32 %v992_v18 }
 0x492   :  { %v734_v19 = vpop.eup %733 }
 0x493   :  { %416 = vrot.lane.b32.xlu0 %v734_v19, %s871_s5 }
 0x505   :  { %v417_v20 = vpop.permute.xlu0 %416 }
 0x506   :  { %v419_v21 = vmul.f32 %v417_v20, %v402_v13 }
 0x508   :  { %421 = vrot.lane.b32.xlu1 %v419_v21, %s872_s29 }
 0x57a   :  { %v422_v23 = vpop.permute.xlu1 %421 }
 0x57b   :  { %688 = vmatmul.msk.f32.vlgmr.msrb.gmra.mxu1 %vm184_vm9, %v422_v23 }
 0x5f8   :  { %v442_v24 = vpop.f32.mrf.mxu1 }
 0x5f9   :  { %v446_v25 = vrot.slane %v442_v24, 6  ;;  %v447_v26 = vrot.slane %v442_v24, 7 }
 0x5fb   :  { %v450_v27 = vadd.f32 %v446_v25, %v959_v49  ;;  %v451_v28 = vadd.f32 %v447_v26, %v962_v51 }
 0x5fd   :  { %v689_v29 = vmul.f32 -1.442695, %v450_v27  ;;  %v690_v30 = vmul.f32 -1.442695, %v451_v28 }
 0x5ff   :  { %735 = vpow2.f32 %v689_v29 }
 0x600   :  { %737 = vpow2.f32 %v690_v30 }
 0x605   :  { %v736_v31 = vpop.eup %735 }
 0x606   :  { %v738_v32 = vpop.eup %737  ;;  %v460_v33 = vadd.f32 1.0, %v736_v31 }
 0x607   :  { %v461_v34 = vadd.f32 1.0, %v738_v32 }
 0x608   :  { %739 = vrcp.f32 %v460_v33  ;;  %v473_v41 = vand.u32 2147483648, %v460_v33  ;;  %v471_v43 = vand.u32 2147483647, %v460_v33  ;;  %vm467_vm1 = vweird.f32 %v460_v33 }
 0x609   :  { %741 = vrcp.f32 %v461_v34  ;;  %v488_v44 = vand.u32 2147483648, %v461_v34  ;;  %v486_v47 = vand.u32 2147483647, %v461_v34  ;;  %vm482_vm3 = vweird.f32 %v461_v34 }
 0x60a   :  { %743 = vtanh.f32 %v450_v27  ;;  %v474_v52 = vor.u32 1.1754944e-38, %v473_v41  ;;  %vm472_vm6 = vcmp.eq.f32.partialorder %v471_v43, 8.507059e+37 }
 0x60b   :  { %745 = vtanh.f32 %v451_v28  ;;  %v489_v56 = vor.u32 1.1754944e-38, %v488_v44  ;;  %vm487_vm8 = vcmp.eq.f32.partialorder %v486_v47, 8.507059e+37 }
 0x60e   :  { %v740_v35 = vpop.eup %739 }
 0x60f   :  { %v742_v36 = vpop.eup %741  ;;  %v463_v37 = vmul.f32 %v740_v35, %v460_v33  ;;  %vm468_vm15 = vweird.f32 %v740_v35 }
 0x610   :  { %v478_v38 = vmul.f32 %v742_v36, %v461_v34  ;;  %v744_v45 = vpop.eup %743  ;;  %vm483_vm0 = vweird.f32 %v742_v36  ;;  %vm469_vm2 = vmor %vm467_vm1, %vm468_vm15 }
 0x611   :  { %v464_v39 = vsub.f32 1.0, %v463_v37  ;;  %v746_v48 = vpop.eup %745  ;;  %v494_v54 = vperm.slane %v744_v45, 2  ;;  %vm484_vm7 = vmor %vm482_vm3, %vm483_vm0 }
 0x612   :  { %v479_v40 = vsub.f32 1.0, %v478_v38  ;;  %v495_v57 = vperm.slane %v746_v48, 2 }
 0x613   :  { %v465_v42 = vmul.f32 %v740_v35, %v464_v39 }
 0x614   :  { %v480_v46 = vmul.f32 %v742_v36, %v479_v40  ;;  %v496_v63 = vsel %vm292_vm4, %v495_v57, %v494_v54 }
 0x615   :  { %v466_v50 = vadd.f32 %v740_v35, %v465_v42 }
 0x616   :  { %v481_v53 = vadd.f32 %v742_v36, %v480_v46 }
 0x617   :  { %v470_v55 = vsel %vm469_vm2, %v740_v35, %v466_v50 }
 0x618   :  { %v475_v58 = vsel %vm472_vm6, %v474_v52, %v470_v55  ;;  %v485_v59 = vsel %vm484_vm7, %v742_v36, %v481_v53 }
 0x619   :  { %v490_v60 = vsel %vm487_vm8, %v489_v56, %v485_v59  ;;  %v500_v61 = vperm.slane %v475_v58, 2  ;;  %v627_v58 = vld [vmem:[%s1049_s6 + $0x18] sm:$0xff]  ;;  %v625_v59 = vld [vmem:[%s1049_s6 + $0x8] sm:$0xff] }
 0x61a   :  { %v501_v62 = vperm.slane %v490_v60, 2  ;;  %649 = vmatpush.msrb.mxu3 %v627_v58  ;;  %v624_v60 = vld [vmem:[%s1049_s6] sm:$0xff] }
 0x61c   :  { %v502_v0 = vsel %vm292_vm4, %v501_v62, %v500_v61  ;;  %650 = vmatpush.msrb.mxu3 %v626_v22 }
 0x61d   :  { %v504_v1 = vsel %vm967_vm5, %v496_v63, %v502_v0  ;;  %v706_v0 = vld [vmem:[%s1050_s7] ss:$0 sm:$0xff] }
 0x61e   :  { %507 = vrot.lane.b32.xlu2 %v504_v1, %s871_s5  ;;  %v505_v4 = vmul.f32 %v504_v1, %v992_v18  ;;  %651 = vmatpush.msrb.mxu3 %v625_v59 }
 0x620   :  { %652 = vmatpush.msrb.mxu3 %v624_v60 }
 0x678   :  { %v508_v2 = vpop.permute.xlu2 %507 }
 0x679   :  { %v510_v3 = vmul.f32 %v508_v2, %v504_v1 }
 0x67b   :  { %512 = vrot.lane.b32.xlu0 %v510_v3, %s872_s29 }
 0x6ed   :  { %v513_v5 = vpop.permute.xlu0 %512 }
 0x6ee   :  { %v1007_v6 = vadd.f32 %v513_v5, %v505_v4 }
 0x6f0   :  { %747 = vtanh.f32 %v1007_v6 }
 0x6f6   :  { %v748_v7 = vpop.eup %747 }
 0x6f7   :  { %518 = vrot.lane.b32.xlu1 %v748_v7, %s871_s5 }
 0x769   :  { %v519_v8 = vpop.permute.xlu1 %518 }
 0x76a   :  { %v521_v9 = vmul.f32 %v519_v8, %v504_v1 }
 0x76c   :  { %523 = vrot.lane.b32.xlu2 %v521_v9, %s872_s29 }
 0x7c6   :  { %v524_v10 = vpop.permute.xlu2 %523 }
 0x7c7   :  { %691 = vmatmul.msk.f32.vlgmr.msrb.gmra.mxu2 %vm184_vm9, %v524_v10 }
 0x84a   :  { %v544_v11 = vpop.f32.mrf.mxu2 }
 0x84b   :  { %v548_v12 = vrot.slane %v544_v11, 5  ;;  %v549_v13 = vrot.slane %v544_v11, 6 }
 0x84d   :  { %v552_v14 = vadd.f32 %v548_v12, %v959_v49  ;;  %v553_v15 = vadd.f32 %v549_v13, %v962_v51 }
 0x84f   :  { %v692_v16 = vmul.f32 -1.442695, %v552_v14  ;;  %v693_v17 = vmul.f32 -1.442695, %v553_v15 }
 0x851   :  { %749 = vpow2.f32 %v692_v16 }
 0x852   :  { %751 = vpow2.f32 %v693_v17 }
 0x857   :  { %v750_v18 = vpop.eup %749 }
 0x858   :  { %v752_v19 = vpop.eup %751  ;;  %v562_v20 = vadd.f32 1.0, %v750_v18 }
 0x859   :  { %v563_v21 = vadd.f32 1.0, %v752_v19 }
 0x85a   :  { %753 = vrcp.f32 %v562_v20  ;;  %v575_v28 = vand.u32 2147483648, %v562_v20  ;;  %v573_v29 = vand.u32 2147483647, %v562_v20  ;;  %vm569_vm12 = vweird.f32 %v562_v20 }
 0x85b   :  { %755 = vrcp.f32 %v563_v21  ;;  %v590_v30 = vand.u32 2147483648, %v563_v21  ;;  %v588_v33 = vand.u32 2147483647, %v563_v21  ;;  %vm584_vm14 = vweird.f32 %v563_v21 }
 0x85c   :  { %757 = vtanh.f32 %v552_v14  ;;  %v576_v36 = vor.u32 1.1754944e-38, %v575_v28  ;;  %vm574_vm15 = vcmp.eq.f32.partialorder %v573_v29, 8.507059e+37 }
 0x85d   :  { %759 = vtanh.f32 %v553_v15  ;;  %v591_v40 = vor.u32 1.1754944e-38, %v590_v30  ;;  %vm589_vm1 = vcmp.eq.f32.partialorder %v588_v33, 8.507059e+37 }
 0x860   :  { %v754_v23 = vpop.eup %753 }
 0x861   :  { %v756_v24 = vpop.eup %755  ;;  %v565_v25 = vmul.f32 %v754_v23, %v562_v20  ;;  %vm570_vm10 = vweird.f32 %v754_v23 }
 0x862   :  { %v580_v26 = vmul.f32 %v756_v24, %v563_v21  ;;  %v758_v31 = vpop.eup %757  ;;  %vm585_vm11 = vweird.f32 %v756_v24  ;;  %vm571_vm13 = vmor %vm569_vm12, %vm570_vm10 }
 0x863   :  { %v566_v27 = vsub.f32 1.0, %v565_v25  ;;  %v760_v34 = vpop.eup %759  ;;  %v596_v38 = vperm.slane %v758_v31, 3  ;;  %vm586_vm0 = vmor %vm584_vm14, %vm585_vm11 }
 0x864   :  { %v581_v49 = vsub.f32 1.0, %v580_v26  ;;  %v597_v41 = vperm.slane %v760_v34, 3 }
 0x865   :  { %v567_v51 = vmul.f32 %v754_v23, %v566_v27 }
 0x866   :  { %v582_v32 = vmul.f32 %v756_v24, %v581_v49  ;;  %v598_v47 = vsel %vm292_vm4, %v597_v41, %v596_v38 }
 0x867   :  { %v568_v35 = vadd.f32 %v754_v23, %v567_v51 }
 0x868   :  { %v583_v37 = vadd.f32 %v756_v24, %v582_v32 }
 0x869   :  { %v572_v39 = vsel %vm571_vm13, %v754_v23, %v568_v35 }
 0x86a   :  { %v577_v42 = vsel %vm574_vm15, %v576_v36, %v572_v39  ;;  %v587_v43 = vsel %vm586_vm0, %v756_v24, %v583_v37 }
 0x86b   :  { %v592_v44 = vsel %vm589_vm1, %v591_v40, %v587_v43  ;;  %v602_v45 = vperm.slane %v577_v42, 3 }
 0x86c   :  { %v603_v46 = vperm.slane %v592_v44, 3 }
 0x86e   :  { %v604_v48 = vsel %vm292_vm4, %v603_v46, %v602_v45  ;;  %vm657_vm4 = vcmask 25600  }
 0x86f   :  { %v606_v50 = vsel %vm967_vm5, %v598_v47, %v604_v48 }
 0x870   :  { %609 = vrot.lane.b32.xlu0 %v606_v50, %s871_s5  ;;  %v607_v54 = vmul.f32 %v606_v50, %v1007_v6 }
 0x8e2   :  { %v610_v52 = vpop.permute.xlu0 %609 }
 0x8e3   :  { %v612_v53 = vmul.f32 %v610_v52, %v606_v50 }
 0x8e5   :  { %614 = vrot.lane.b32.xlu1 %v612_v53, %s872_s29 }
 0x957   :  { %v615_v55 = vpop.permute.xlu1 %614 }
 0x958   :  { %v617_v56 = vadd.f32 %v615_v55, %v607_v54 }
 0x95a   :  { %761 = vtanh.f32 %v617_v56 }
 0x960   :  { %v762_v57 = vpop.eup %761 }
 0x961   :  { %620 = vrot.lane.b32.xlu2 %v762_v57, %s871_s5 }
 0x9bb   :  { %v621_v61 = vpop.permute.xlu2 %620 }
 0x9bc   :  { %v623_v62 = vmul.f32 %v621_v61, %v606_v50 }
 0x9be   :  { %633 = vrot.lane.b32.xlu0 %v623_v62, %s872_s29 }
 0xa30   :  { %v634_v63 = vpop.permute.xlu0 %633 }
 0xa31   :  { %694 = vmatmul.msk.f32.vlgmr.msrb.gmra.mxu3 %vm184_vm9, %v634_v63 }
 0xab4   :  { %v654_v1 = vpop.f32.mrf.mxu3 }
 0xab5   :  { %v655_v2 = vadd.f32 %v706_v0, %v654_v1 }
 0xab7   :  { %658 = vst.msk [vmem:[#allocation8] sm:$0x3] %vm657_vm4, %v655_v2 }
 0xab8   :  { %669 = dma.vmem_to_hbm [thread:$0]  %s665_s19, 32, %s667_s0, [#allocation4]  }
 0xab9   :  { %863 = dma.done.wait [#allocation4], 32  }
 0xaba   :  { %864 = vsyncadd [#allocation4], 4294967264 }
 0xabb   :  { %674 = vsyncpa [#allocation3], 1 }
 0xabc   :  { %675 = vsyncpa [#allocation6], 1 }
 0xabd   :  { %676 = vsyncpa [#allocation4], 1 }

</bundles_post_ra>
